<compile_context>
chip_gen: v6e
topology: v6e:2x2x1
jax: 0.10.0
libtpu: 0.0.40
codegen_flags: <defaults>
</compile_context>

<pallas_src>
import functools

import jax
import jax.numpy as jnp
from jax.experimental import pallas as pl
from jax.experimental.pallas import tpu as pltpu


_SUBLANE = 8
_MAX_TILE_B = 1024                       # v5e/v6e large-tile sweet spot (~86% HBM roofline)
_TILE_VMEM_BUDGET = 24 * 1024 * 1024     # budget for double-buffered streamed tiles
_VMEM_LIMIT_BYTES = 48 * 1024 * 1024     # explicit scoped-VMEM limit (fits v7x 64 MiB)


def _round_up(x, m):
    return ((x + m - 1) // m) * m


def _singlehead_kernel(x_ref, w1_ref, b1_ref, w2_ref, b2_ref,
                       out_ref, act_ref, *, compute_dtype):
    # features: Linear(input_dim -> feat_dim).  Cast to the streaming/MXU dtype
    # happens HERE (free VPU work under the DMA), not in the wrapper.
    x = x_ref[...].astype(compute_dtype)
    w1 = w1_ref[...].astype(compute_dtype)
    h = jnp.dot(x, w1, preferred_element_type=jnp.float32)
    # bias + nonlinearity (ReLU) in f32 on the VPU (works on all chip gens).
    h = jnp.maximum(h + b1_ref[...], 0.0)
    # state['activation'].append(h) -> streamed out at its true lane width.
    act_ref[...] = h.astype(act_ref.dtype)
    # classifier: Linear(feat_dim -> output_dim), f32 accumulation on the MXU.
    w2 = w2_ref[...].astype(compute_dtype)
    out = jnp.dot(h.astype(compute_dtype), w2,
                  preferred_element_type=jnp.float32) + b2_ref[...]
    out_ref[...] = out.astype(out_ref.dtype)


def _pick_tile_b(B, input_dim, feat_dim, output_dim, act_itemsize):
    """Auto batch-tile: >=2 grid steps (v7x megacore), VMEM-aware, <=1024 rows."""
    # At least two grid steps when B allows it so both v7x TensorCores get work.
    tb = _round_up(max(pl.cdiv(B, 2), _SUBLANE), _SUBLANE)
    tb = min(tb, _MAX_TILE_B)
    # Streamed bytes per batch row (x in, logits + activation out), x2 for the
    # pipeline's double buffering.
    per_row = 2 * (input_dim * 4 + output_dim * 4 + feat_dim * act_itemsize)
    cap = max(_SUBLANE, (_TILE_VMEM_BUDGET // max(per_row, 1)) // _SUBLANE * _SUBLANE)
    return max(_SUBLANE, min(tb, cap))


def singlehead_forward(x, w_feat, b_feat, w_cls, b_cls, *,
                       tile_b=None,
                       compute_dtype=jnp.float32,
                       act_dtype=jnp.bfloat16):
    """Fused forward pass of SingleheadNetwork.

    Args:
      x:      [B, input_dim]          float32 (or bf16)
      w_feat: [input_dim, feat_dim]   (transposed PyTorch layout)
      b_feat: [feat_dim]
      w_cls:  [feat_dim, output_dim]  (transposed PyTorch layout)
      b_cls:  [output_dim]
      tile_b: batch rows per grid step; None -> auto (megacore/VMEM aware).
      compute_dtype: dtype of operands fed to the MXU (cast in-kernel).
      act_dtype: storage dtype of the activation returned in `state`.

    Returns:
      (logits [B, output_dim] float32, {'activation': [h [B, feat_dim]]})
    """
    B, input_dim = x.shape
    feat_dim = w_feat.shape[1]
    output_dim = w_cls.shape[1]
    act_itemsize = jnp.dtype(act_dtype).itemsize

    if tile_b is None:
        tb = _pick_tile_b(B, input_dim, feat_dim, output_dim, act_itemsize)
    else:
        tb = max(_SUBLANE,
                 _round_up(min(int(tile_b), _round_up(B, _SUBLANE)), _SUBLANE))

    grid = (pl.cdiv(B, tb),)   # ragged last block: OOB rows masked on write

    # Biases as (1, N) rows for 2-D VMEM layout (tiny; the only wrapper-side op).
    b1 = b_feat.reshape(1, feat_dim).astype(jnp.float32)
    b2 = b_cls.reshape(1, output_dim).astype(jnp.float32)

    flops = 2 * B * input_dim * feat_dim + 2 * B * feat_dim * output_dim
    bytes_accessed = (x.size * x.dtype.itemsize
                      + w_feat.size * w_feat.dtype.itemsize
                      + w_cls.size * w_cls.dtype.itemsize
                      + (feat_dim + output_dim) * 4
                      + B * output_dim * 4
                      + B * feat_dim * act_itemsize)

    kernel = functools.partial(_singlehead_kernel, compute_dtype=compute_dtype)

    logits, act = pl.pallas_call(
        kernel,
        grid=grid,
        out_shape=(
            jax.ShapeDtypeStruct((B, output_dim), jnp.float32),
            jax.ShapeDtypeStruct((B, feat_dim), act_dtype),
        ),
        in_specs=[
            pl.BlockSpec((tb, input_dim), lambda i: (i, 0)),        # x: streamed
            pl.BlockSpec((input_dim, feat_dim), lambda i: (0, 0)),  # w_feat: resident
            pl.BlockSpec((1, feat_dim), lambda i: (0, 0)),          # b_feat: resident
            pl.BlockSpec((feat_dim, output_dim), lambda i: (0, 0)), # w_cls: resident
            pl.BlockSpec((1, output_dim), lambda i: (0, 0)),        # b_cls: resident
        ],
        out_specs=(
            pl.BlockSpec((tb, output_dim), lambda i: (i, 0)),       # logits
            pl.BlockSpec((tb, feat_dim), lambda i: (i, 0)),         # activation
        ),
        compiler_params=pltpu.CompilerParams(
            dimension_semantics=("parallel",),       # megacore sharding on v7x
            vmem_limit_bytes=_VMEM_LIMIT_BYTES,
        ),
        cost_estimate=pl.CostEstimate(
            flops=flops, transcendentals=0, bytes_accessed=bytes_accessed),
    )(x, w_feat, b1, w_cls, b2)

    state = {'activation': [act]}
    return logits, state


def _reference_forward(x, w_feat, b_feat, w_cls, b_cls):
    h = jnp.maximum(x @ w_feat + b_feat, 0.0)
    return h @ w_cls + b_cls, h


if __name__ == "__main__":
    key = jax.random.PRNGKey(0)
    k1, k2, k3, k4, k5 = jax.random.split(key, 5)

    B = 8            # batch
    input_dim = 32   # features.input_dim
    feat_dim = 64    # features.output_dim
    output_dim = 16  # classifier output_dim

    x = jax.random.normal(k1, (B, input_dim), dtype=jnp.float32)
    # Deterministic (PyTorch-style uniform fan-in) initialization, in-script.
    bound1 = 1.0 / jnp.sqrt(input_dim)
    bound2 = 1.0 / jnp.sqrt(feat_dim)
    w_feat = jax.random.uniform(k2, (input_dim, feat_dim),
                                minval=-bound1, maxval=bound1, dtype=jnp.float32)
    b_feat = jax.random.uniform(k3, (feat_dim,),
                                minval=-bound1, maxval=bound1, dtype=jnp.float32)
    w_cls = jax.random.uniform(k4, (feat_dim, output_dim),
                               minval=-bound2, maxval=bound2, dtype=jnp.float32)
    b_cls = jax.random.uniform(k5, (output_dim,),
                               minval=-bound2, maxval=bound2, dtype=jnp.float32)

    ref_logits, ref_act = _reference_forward(x, w_feat, b_feat, w_cls, b_cls)

    # 1) Exact f32 path (f32 compute, f32 activation storage).
    logits, state = singlehead_forward(x, w_feat, b_feat, w_cls, b_cls,
                                       compute_dtype=jnp.float32,
                                       act_dtype=jnp.float32)
    logits = jax.block_until_ready(logits)
    act = jax.block_until_ready(state['activation'][0])
    assert logits.shape == (B, output_dim)
    assert act.shape == (B, feat_dim)
    assert jnp.allclose(logits, ref_logits, atol=1e-5, rtol=1e-5)
    assert jnp.allclose(act, ref_act, atol=1e-5, rtol=1e-5)

    # 2) Default path: f32 compute, bf16 activation storage -> exact logits,
    #    bf16-rounded activation.
    logits_d, state_d = singlehead_forward(x, w_feat, b_feat, w_cls, b_cls)
    logits_d = jax.block_until_ready(logits_d)
    act_d = jax.block_until_ready(state_d['activation'][0])
    assert act_d.dtype == jnp.bfloat16
    assert jnp.allclose(logits_d, ref_logits, atol=1e-5, rtol=1e-5)
    assert jnp.allclose(act_d.astype(jnp.float32), ref_act, atol=5e-2, rtol=5e-2)

    # 3) bf16 streaming operands (halved MXU-operand bytes), relaxed tolerance.
    logits_bf, state_bf = singlehead_forward(
        x, w_feat, b_feat, w_cls, b_cls, compute_dtype=jnp.bfloat16)
    logits_bf = jax.block_until_ready(logits_bf)
    act_bf = jax.block_until_ready(state_bf['activation'][0])
    assert jnp.allclose(logits_bf, ref_logits, atol=5e-2, rtol=5e-2)
    assert jnp.allclose(act_bf.astype(jnp.float32), ref_act, atol=5e-2, rtol=5e-2)

    # 4) Ragged batch, no wrapper pad: auto tile (grid=2, partial last block)
    #    and explicit tile_b=128 (grid=3, 44 valid rows in the last block).
    B_big = 300
    x_big = jax.random.normal(k1, (B_big, input_dim), dtype=jnp.float32)
    ref_logits_b, ref_act_b = _reference_forward(x_big, w_feat, b_feat, w_cls, b_cls)

    logits_b, state_b = singlehead_forward(x_big, w_feat, b_feat, w_cls, b_cls,
                                           act_dtype=jnp.float32)
    logits_b = jax.block_until_ready(logits_b)
    act_b = jax.block_until_ready(state_b['activation'][0])
    assert logits_b.shape == (B_big, output_dim)
    assert act_b.shape == (B_big, feat_dim)
    assert jnp.allclose(logits_b, ref_logits_b, atol=1e-5, rtol=1e-5)
    assert jnp.allclose(act_b, ref_act_b, atol=1e-5, rtol=1e-5)

    logits_c, state_c = singlehead_forward(x_big, w_feat, b_feat, w_cls, b_cls,
                                           tile_b=128, act_dtype=jnp.float32)
    logits_c = jax.block_until_ready(logits_c)
    act_c = jax.block_until_ready(state_c['activation'][0])
    assert jnp.allclose(logits_c, ref_logits_b, atol=1e-5, rtol=1e-5)
    assert jnp.allclose(act_c, ref_act_b, atol=1e-5, rtol=1e-5)

    print("KERNEL_OK")
</pallas_src>

<mosaic_0001>
module attributes {stable_mosaic.version = 11 : i64} {
  func.func @_singlehead_kernel(%arg0: i32, %arg1: memref<8x32xf32, #tpu.memory_space<vmem>>, %arg2: memref<32x64xf32, #tpu.memory_space<vmem>>, %arg3: memref<1x64xf32, #tpu.memory_space<vmem>>, %arg4: memref<64x16xf32, #tpu.memory_space<vmem>>, %arg5: memref<1x16xf32, #tpu.memory_space<vmem>>, %arg6: memref<8x16xf32, #tpu.memory_space<vmem>>, %arg7: memref<8x64xf32, #tpu.memory_space<vmem>>) attributes {dimension_semantics = [#tpu.dimension_semantics<parallel>], iteration_bounds = array<i64: 1>, scalar_prefetch = 0 : i64, scratch_operands = 0 : i64, tpu.core_type = #tpu.core_type<tc>, window_params = [{transform_indices = @transform_0, window_bounds = array<i64: 8, 32>}, {pipeline_mode = #tpu.pipeline_mode<synchronous>, transform_indices = @transform_1, window_bounds = array<i64: 32, 64>}, {pipeline_mode = #tpu.pipeline_mode<synchronous>, transform_indices = @transform_2, window_bounds = array<i64: 1, 64>}, {pipeline_mode = #tpu.pipeline_mode<synchronous>, transform_indices = @transform_3, window_bounds = array<i64: 64, 16>}, {pipeline_mode = #tpu.pipeline_mode<synchronous>, transform_indices = @transform_4, window_bounds = array<i64: 1, 16>}, {transform_indices = @transform_5, window_bounds = array<i64: 8, 16>}, {transform_indices = @transform_6, window_bounds = array<i64: 8, 64>}]} {
    %c0 = arith.constant 0 : index
    %c0_0 = arith.constant 0 : index
    %0 = vector.load %arg1[%c0, %c0_0] : memref<8x32xf32, #tpu.memory_space<vmem>>, vector<8x32xf32>
    %c0_1 = arith.constant 0 : index
    %c0_2 = arith.constant 0 : index
    %1 = vector.load %arg2[%c0_1, %c0_2] : memref<32x64xf32, #tpu.memory_space<vmem>>, vector<32x64xf32>
    %cst = arith.constant dense<0.000000e+00> : vector<8x64xf32>
    %2 = tpu.matmul %0, %1, %cst {dimension_numbers = #tpu.dot_dimension_numbers<[1], [0], [0], [1], [0, 0, 1, 1], [], []>} : vector<8x32xf32>, vector<32x64xf32>, vector<8x64xf32> -> vector<8x64xf32>
    %c0_3 = arith.constant 0 : index
    %c0_4 = arith.constant 0 : index
    %3 = vector.load %arg3[%c0_3, %c0_4] : memref<1x64xf32, #tpu.memory_space<vmem>>, vector<1x64xf32>
    %4 = vector.broadcast %3 : vector<1x64xf32> to vector<8x64xf32>
    %5 = arith.addf %2, %4 : vector<8x64xf32>
    %cst_5 = arith.constant 0.000000e+00 : f32
    %6 = vector.broadcast %cst_5 : f32 to vector<8x64xf32>
    %7 = arith.maximumf %5, %6 : vector<8x64xf32>
    %c0_6 = arith.constant 0 : index
    %c0_7 = arith.constant 0 : index
    %8 = vector.load %arg7[%c0_6, %c0_7] : memref<8x64xf32, #tpu.memory_space<vmem>>, vector<8x64xf32>
    tpu.vector_store %arg7[%c0_6, %c0_7], %7 {strides = array<i32>} : memref<8x64xf32, #tpu.memory_space<vmem>>, vector<8x64xf32>,
    %c0_8 = arith.constant 0 : index
    %c0_9 = arith.constant 0 : index
    %9 = vector.load %arg4[%c0_8, %c0_9] : memref<64x16xf32, #tpu.memory_space<vmem>>, vector<64x16xf32>
    %cst_10 = arith.constant dense<0.000000e+00> : vector<8x16xf32>
    %10 = tpu.matmul %7, %9, %cst_10 {dimension_numbers = #tpu.dot_dimension_numbers<[1], [0], [0], [1], [0, 0, 1, 1], [], []>} : vector<8x64xf32>, vector<64x16xf32>, vector<8x16xf32> -> vector<8x16xf32>
    %c0_11 = arith.constant 0 : index
    %c0_12 = arith.constant 0 : index
    %11 = vector.load %arg5[%c0_11, %c0_12] : memref<1x16xf32, #tpu.memory_space<vmem>>, vector<1x16xf32>
    %12 = vector.broadcast %11 : vector<1x16xf32> to vector<8x16xf32>
    %13 = arith.addf %10, %12 : vector<8x16xf32>
    %c0_13 = arith.constant 0 : index
    %c0_14 = arith.constant 0 : index
    %14 = vector.load %arg6[%c0_13, %c0_14] : memref<8x16xf32, #tpu.memory_space<vmem>>, vector<8x16xf32>
    tpu.vector_store %arg6[%c0_13, %c0_14], %13 {strides = array<i32>} : memref<8x16xf32, #tpu.memory_space<vmem>>, vector<8x16xf32>,
    return
  }
  func.func @transform_0(%arg0: i32) -> (i32, i32) {
    %c0_i32 = arith.constant 0 : i32
    %c0_i32_0 = arith.constant 0 : i32
    return %arg0, %c0_i32 : i32, i32
  }
  func.func @transform_1(%arg0: i32) -> (i32, i32) {
    %c0_i32 = arith.constant 0 : i32
    %c0_i32_0 = arith.constant 0 : i32
    %c0_i32_1 = arith.constant 0 : i32
    return %c0_i32, %c0_i32_0 : i32, i32
  }
  func.func @transform_2(%arg0: i32) -> (i32, i32) {
    %c0_i32 = arith.constant 0 : i32
    %c0_i32_0 = arith.constant 0 : i32
    %c0_i32_1 = arith.constant 0 : i32
    return %c0_i32, %c0_i32_0 : i32, i32
  }
  func.func @transform_3(%arg0: i32) -> (i32, i32) {
    %c0_i32 = arith.constant 0 : i32
    %c0_i32_0 = arith.constant 0 : i32
    %c0_i32_1 = arith.constant 0 : i32
    return %c0_i32, %c0_i32_0 : i32, i32
  }
  func.func @transform_4(%arg0: i32) -> (i32, i32) {
    %c0_i32 = arith.constant 0 : i32
    %c0_i32_0 = arith.constant 0 : i32
    %c0_i32_1 = arith.constant 0 : i32
    return %c0_i32, %c0_i32_0 : i32, i32
  }
  func.func @transform_5(%arg0: i32) -> (i32, i32) {
    %c0_i32 = arith.constant 0 : i32
    %c0_i32_0 = arith.constant 0 : i32
    return %arg0, %c0_i32 : i32, i32
  }
  func.func @transform_6(%arg0: i32) -> (i32, i32) {
    %c0_i32 = arith.constant 0 : i32
    %c0_i32_0 = arith.constant 0 : i32
    return %arg0, %c0_i32 : i32, i32
  }
}

</mosaic_0001>

<bundles_post_ra>
// kernel: tpu_custom_call.1
= control target key start
LH: loop header
LB: loop body
LE: loop exit
PB: predicated region body
PF: predicated region fallthrough
CT: control target
= control target key end

     0   :  { %12 = vsyncpa [#allocation3], 0  ;;  %v327_v1 = vmov 0.0   ;;  %vm328_vm0 = vmmov 0   ;;  %s419_s0 = inlined_call_operand.vmem [shape: f32[8,32], index: 0, kind: input, shape index: {}]   ;;  %s420_s1 = inlined_call_operand.vmem [shape: f32[32,64], index: 1, kind: input, shape index: {}]   ;;  %s421_s2 = inlined_call_operand.vmem [shape: f32[1,64], index: 2, kind: input, shape index: {}]   ;;  %s422_s3 = inlined_call_operand.vmem [shape: f32[64,16], index: 3, kind: input, shape index: {}]   ;;  %s423_s4 = inlined_call_operand.vmem [shape: f32[1,16], index: 4, kind: input, shape index: {}]   ;;  %s424_s5 = inlined_call_operand.hbm [shape: f32[8,16], index: 5, kind: output, shape index: {0}]   ;;  %s425_s6 = inlined_call_operand.hbm [shape: f32[8,64], index: 6, kind: output, shape index: {1}]  }
   0x1   :  { %v28_v0 = vld [vmem:[%s420_s1 + $0x18] sm:$0xff]  ;;  %249 = vmatprep.subr.mxu0 %v327_v1  ;;  %v27_v2 = vld [vmem:[%s420_s1 + $0x10] sm:$0xff]  ;;  %257 = vmatprep.mubr.msk.f32.mxu0 %vm328_vm0, %v327_v1  ;;  %v26_v5 = vld [vmem:[%s420_s1 + $0x8] sm:$0xff] }
   0x2   :  { %v120_v3 = vld [vmem:[%s422_s3 + $0x38] sm:$0xff]  ;;  %250 = vmatpush3.msra.mxu0 %v28_v0  ;;  %260 = vmatprep.subr.mxu1 %v327_v1  ;;  %v119_v4 = vld [vmem:[%s422_s3 + $0x30] sm:$0xff] }
   0x3   :  { %251 = vmatprep.subr.mxu0 %v327_v1  ;;  %261 = vmatpush3.msra.mxu1 %v120_v3 }
   0x4   :  { %13 = vsyncpa [#allocation5], 0  ;;  %252 = vmatpush3.msra.mxu0 %v27_v2  ;;  %262 = vmatprep.subr.mxu1 %v327_v1  ;;  %v118_v6 = vld [vmem:[%s422_s3 + $0x28] sm:$0xff]  ;;  %v25_v7 = vld [vmem:[%s420_s1] sm:$0xff]  ;;  %vm36_vm1 = vcmask 261120   ;;  %vm111_vm2 = vcmask 523264  }
   0x5   :  { %253 = vmatprep.subr.mxu0 %v327_v1  ;;  %263 = vmatpush3.msra.mxu1 %v119_v4  ;;  %v24_v8 = vld [vmem:[%s419_s0] sm:$0xff]  ;;  %v116_v10 = vld [vmem:[%s422_s3 + $0x18] sm:$0xff]  ;;  %v115_v11 = vld [vmem:[%s422_s3 + $0x10] sm:$0xff]  ;;  %s329_s23 = smov [#allocation4]  }
   0x6   :  { %254 = vmatpush3.msra.mxu0 %v26_v5  ;;  %264 = vmatprep.subr.mxu1 %v327_v1  ;;  %v117_v9 = vld [vmem:[%s422_s3 + $0x20] sm:$0xff]  ;;  %v114_v12 = vld [vmem:[%s422_s3 + $0x8] sm:$0xff]  ;;  %s219_s24 = sshll.u32 %s329_s23, 4  ;;  %s220_s24 = int_to_ptr.vmem [resolvable:$true] %s219_s24 }
   0x7   :  { %255 = vmatprep.subr.mxu0 %v327_v1  ;;  %265 = vmatpush3.msra.mxu1 %v118_v6  ;;  %v113_v13 = vld [vmem:[%s422_s3] sm:$0xff]  ;;  %s283_s25 = scalar_lea.vmem %s220_s24, 128  ;;  %p288_p1 = scmp.lt.s32.totalorder %s220_s24, %s220_s24 }
   0x8   :  { %256 = vmatpush3.msra.mxu0 %v25_v7  ;;  %266 = vmatprep.subr.mxu1 %v327_v1  ;;  %v231_v14 = vld [vmem:[%s421_s2] ss:$0 sm:$0xff]  ;;  %p284_p0 = scmp.ne.s32.totalorder %s220_s24, %s283_s25  ;;  %p289_p2 = scmp.lt.s32.totalorder %s283_s25, %s283_s25 }
   0x9   :  { %258 = vmatmul.mubr.msk.f32.vlgmr.msra.gmra.mxu0 %vm36_vm1, %v24_v8  ;;  %267 = vmatpush3.msra.mxu1 %v117_v9 }
   0xa   :  { %268 = vmatprep.subr.mxu1 %v327_v1  ;;  %276 = vmatprep.mubr.msk.f32.mxu1 %vm328_vm0, %v327_v1  ;;  %p290_p3 = por %p289_p2, %p288_p1 }
   0xb   :  { %269 = vmatpush3.msra.mxu1 %v116_v10 }
   0xc   :  { %270 = vmatprep.subr.mxu1 %v327_v1  ;;  %p291_p4 = pnand %p290_p3, %p284_p0 }
   0xd   :  { %271 = vmatpush3.msra.mxu1 %v115_v11 }
   0xe   :  { %272 = vmatprep.subr.mxu1 %v327_v1 }
   0xf   :  { %273 = vmatpush3.msra.mxu1 %v114_v12 }
  0x10   :  { %274 = vmatprep.subr.mxu1 %v327_v1 }
  0x11   :  { %275 = vmatpush3.msra.mxu1 %v113_v13 }
  0xc9   :  { %v106_v15 = vpop.f32.mrf.mxu0 }
  0xca   :  { %v107_v16 = vadd.f32 %v231_v14, %v106_v15 }
  0xcb   :  { %v259_v17 = vpop.f32.mrf.mxu0 }
  0xcc   :  { %v110_v18 = vmax.f32 %v107_v16, 0.0 }
  0xce   :  { %277 = vmatmul.mubr.msk.f32.vlgmr.msra.gmra.mxu1 %vm111_vm2, %v110_v18  ;;  %112 = vst.msk [vmem:[#allocation4] sm:$0xff] %vm111_vm2, %v110_v18 }
  0xcf   :  { %294 = shalt.err (!%p291_p4)
}
  0xd0   :  { %222 = dma.vmem_to_hbm [thread:$0]  %s220_s24, 128, %s425_s6, [#allocation5]   ;;  %v233_v19 = vld [vmem:[%s423_s4] ss:$0 sm:$0xff]  ;;  %vm201_vm3 = vcmask 130048  }
  0xd1   :  { %s330_s28 = smov [#allocation2]  }
  0xd2   :  { %s209_s29 = sshll.u32 %s330_s28, 4  ;;  %s210_s29 = int_to_ptr.vmem [resolvable:$true] %s209_s29 }
  0xd3   :  { %s303_s30 = scalar_lea.vmem %s210_s29, 128  ;;  %p308_p6 = scmp.lt.s32.totalorder %s210_s29, %s210_s29 }
  0xd4   :  { %p304_p5 = scmp.ne.s32.totalorder %s210_s29, %s303_s30  ;;  %p309_p7 = scmp.lt.s32.totalorder %s303_s30, %s303_s30 }
  0xd6   :  { %p310_p8 = por %p309_p7, %p308_p6 }
  0xd8   :  { %p311_p9 = pnand %p310_p8, %p304_p5 }
 0x18e   :  { %v197_v20 = vpop.f32.mrf.mxu1 }
 0x18f   :  { %v198_v21 = vadd.f32 %v233_v19, %v197_v20 }
 0x190   :  { %v278_v22 = vpop.f32.mrf.mxu1 }
 0x191   :  { %202 = vst.msk [vmem:[#allocation2] sm:$0xff] %vm201_vm3, %v198_v21 }
 0x192   :  { %314 = shalt.err (!%p311_p9)
}
 0x193   :  { %212 = dma.vmem_to_hbm [thread:$0]  %s210_s29, 128, %s424_s5, [#allocation3]  }
 0x194   :  { %323 = dma.done.wait [#allocation3], 128  }
 0x195   :  { %324 = vsyncadd [#allocation3], 4294967168 }
 0x196   :  { %325 = dma.done.wait [#allocation5], 128  }
 0x197   :  { %326 = vsyncadd [#allocation5], 4294967168 }
 0x198   :  { %229 = vsyncpa [#allocation3], 1 }
 0x199   :  { %230 = vsyncpa [#allocation5], 1 }

</bundles_post_ra>
